<compile_context>
chip_gen: v6e
topology: v6e:2x2x1
jax: 0.10.0
libtpu: 0.0.40
codegen_flags: <defaults>
</compile_context>

<pallas_src>
import functools

import jax
import jax.numpy as jnp
from jax import lax
from jax.experimental import pallas as pl
from jax.experimental.pallas import tpu as pltpu


def _mcmc_kernel(x_ref, ys_ref, w_ref, noise_ref, logr_ref,    # inputs
                 zs_ref, de_ref,                                # outputs
                 x_sc, e0_sc, ecur_sc,                          # VMEM scratch
                 *, lambd, noise_std, steps_per_iter, mxu_dtype):
    """K fused MH steps for one batch tile. Grid = (batch_tiles, S // K)."""
    it = pl.program_id(1)
    n_iters = pl.num_programs(1)

    ys = ys_ref[...]                                            # (Bt, Dy) f32
    w_m = w_ref[...].astype(mxu_dtype)                          # (D,  Dy)
    lp_scale = 0.5 * lambd
    pr_scale = 0.5 * (1.0 - lambd)

    def energy(x):
        # lambd * log_posterior(x, ys) + (1 - lambd) * 0.5 * ||x||^2.
        # Matmul operands in bf16 (MXU); accumulation, prior term and accept
        # test in f32. Scale factors applied AFTER the reduction (only (Bt,1)).
        resid = jnp.dot(x.astype(mxu_dtype), w_m,
                        preferred_element_type=jnp.float32) - ys
        lp = lp_scale * jnp.sum(resid * resid, axis=1, keepdims=True)
        pr = pr_scale * jnp.sum(x * x, axis=1, keepdims=True)
        return lp + pr                                          # (Bt, 1)

    # Initialize the chain state on the first fused block of this batch tile.
    @pl.when(it == 0)
    def _():
        x0 = x_ref[...]
        e0 = energy(x0)
        x_sc[...] = x0
        e0_sc[...] = e0
        ecur_sc[...] = e0

    def mh_step(k, carry):
        x_curr, e_curr = carry
        x_prop = x_curr + noise_std * noise_ref[k].astype(jnp.float32)
        e_prop = energy(x_prop)
        # Log-domain Metropolis test: log r < e_curr - e_prop  <=>  r < exp(-dE)
        accept = logr_ref[k] < (e_curr - e_prop)                # (Bt, 1) bool
        x_new = jnp.where(accept, x_prop, x_curr)               # vselect
        e_new = jnp.where(accept, e_prop, e_curr)               # carried energy
        return x_new, e_new

    x_fin, e_fin = lax.fori_loop(0, steps_per_iter, mh_step,
                                 (x_sc[...], ecur_sc[...]), unroll=True)

    x_sc[...] = x_fin
    ecur_sc[...] = e_fin

    @pl.when(it == n_iters - 1)
    def _():
        zs_ref[...] = x_fin
        # Lane-padded (Bt, 128) store -> unmasked vst; host slices column 0.
        de_ref[...] = jnp.broadcast_to(e_fin - e0_sc[...], de_ref.shape)


# ----------------------------------------------------------------------------
# Tiling / budget helpers
# ----------------------------------------------------------------------------
def _divisors_desc(n):
    return [d for d in range(n, 0, -1) if n % d == 0]


def _pick_steps_per_iter(S, requested):
    if requested is not None:
        assert S % requested == 0, "steps_per_iter must divide metr_steps"
        return requested
    # Fuse up to 8 MH steps per grid iteration (amortizes ~0.35 us / ~600 cyc
    # of per-grid-step overhead).
    for k in _divisors_desc(S):
        if k <= 8:
            return k
    return 1


def _pick_block_b(B, requested):
    if requested is not None:
        assert B % requested == 0
        assert requested == B or requested % 8 == 0
        return requested
    if B % 16 != 0:
        return B
    # Target large MXU-M tiles (128+ on v5e, 256-512 on v6e/v7x) but keep at
    # least 2 batch tiles so the "parallel" grid axis can shard across both
    # TensorCores on v7x. Multiples of 16 keep bf16 sublane packing clean.
    for cand in (512, 256, 128, 64, 32, 16):
        if B % cand == 0 and B // cand >= 2:
            return cand
    return B


def _vmem_limit_bytes():
    phys = 128 * 1024 * 1024
    try:
        phys = int(pltpu.get_tpu_info().vmem_capacity_bytes)
    except Exception:
        pass
    # ~75% of physical: ~48 MiB on v7x (64 MiB), ~96 MiB on v5e/v6e (128 MiB),
    # capped at 100 MiB per the perf review.
    return min((phys * 3) // 4, 100 * 1024 * 1024)


def _vmem_bytes_estimate(block_b, D, Dy, K):
    lane = 128

    def pad(n):
        return ((n + lane - 1) // lane) * lane

    in_bytes = (block_b * pad(D) * 4          # xs
                + block_b * pad(Dy) * 4       # ys
                + D * pad(Dy) * 4             # W
                + K * block_b * pad(D) * 2    # noise (bf16)
                + K * block_b * lane * 4)     # log_r (lane-padded)
    out_bytes = block_b * pad(D) * 4 + block_b * lane * 4
    scratch = block_b * pad(D) * 4 + 2 * block_b * lane * 4
    return 2 * (in_bytes + out_bytes) + scratch   # double-buffered pipeline


# ----------------------------------------------------------------------------
# Wrapper
# ----------------------------------------------------------------------------
def mcmc_layer_forward(xs, ys, W, noise, r, *, lambd, noise_std,
                       block_b=None, steps_per_iter=None,
                       mxu_dtype=jnp.bfloat16):
    """Pallas wrapper for MCMC_layer.forward. Returns (zs, e)."""
    B, D = xs.shape
    Dy = ys.shape[1]
    S = noise.shape[0]
    assert S >= 1, "metr_steps_per_block must be >= 1"

    block_b = _pick_block_b(B, block_b)
    K = _pick_steps_per_iter(S, steps_per_iter)

    # Shrink the fused-step count / batch tile if the working set would exceed
    # the per-generation VMEM budget.
    vmem_limit = _vmem_limit_bytes()
    budget = int(vmem_limit * 0.85)
    while _vmem_bytes_estimate(block_b, D, Dy, K) > budget:
        if K > 1:
            K = max(d for d in _divisors_desc(S) if d < K)
        elif (block_b > 16 and (block_b // 2) % 8 == 0
              and B % (block_b // 2) == 0):
            block_b //= 2
        else:
            break

    nb = B // block_b
    n_iters = S // K

    # Host/XLA-side prep:
    #  - log of the uniform draws (removes per-step exp, avoids overflow),
    #  - noise streamed as bf16 (halves the dominant HBM traffic).
    log_r = jnp.log(r).astype(jnp.float32)
    noise_bf16 = noise.astype(jnp.bfloat16)

    kernel = functools.partial(
        _mcmc_kernel, lambd=float(lambd), noise_std=float(noise_std),
        steps_per_iter=K, mxu_dtype=mxu_dtype)

    flops = int(2 * (S + nb) * B * D * Dy + 8 * S * B * D)
    bytes_accessed = int(2 * S * B * D + 4 * S * B
                         + 4 * B * (2 * D + Dy + 128) + 4 * D * Dy)

    zs, de_pad = pl.pallas_call(
        kernel,
        out_shape=(
            jax.ShapeDtypeStruct((B, D), jnp.float32),
            jax.ShapeDtypeStruct((B, 128), jnp.float32),   # lane-padded de
        ),
        grid_spec=pltpu.PrefetchScalarGridSpec(
            num_scalar_prefetch=0,
            grid=(nb, n_iters),                 # fused-step axis innermost
            in_specs=[
                pl.BlockSpec((block_b, D), lambda b, s: (b, 0)),        # xs
                pl.BlockSpec((block_b, Dy), lambda b, s: (b, 0)),       # ys
                pl.BlockSpec((D, Dy), lambda b, s: (0, 0)),             # W
                pl.BlockSpec((K, block_b, D), lambda b, s: (s, b, 0)),  # noise
                pl.BlockSpec((K, block_b, 1), lambda b, s: (s, b, 0)),  # log_r
            ],
            out_specs=(
                pl.BlockSpec((block_b, D), lambda b, s: (b, 0)),        # zs
                pl.BlockSpec((block_b, 128), lambda b, s: (b, 0)),      # de
            ),
            scratch_shapes=[
                pltpu.VMEM((block_b, D), jnp.float32),   # x_curr
                pltpu.VMEM((block_b, 1), jnp.float32),   # e0
                pltpu.VMEM((block_b, 1), jnp.float32),   # carried e_curr
            ],
        ),
        compiler_params=pltpu.CompilerParams(
            dimension_semantics=("parallel", "arbitrary"),
            vmem_limit_bytes=vmem_limit,
        ),
        cost_estimate=pl.CostEstimate(
            flops=flops, transcendentals=0, bytes_accessed=bytes_accessed),
    )(xs, ys, W, noise_bf16, log_r)

    return zs, de_pad[:, 0]


# ----------------------------------------------------------------------------
# Pure-JAX reference (mirrors the kernel math: carried energy, bf16 matmul
# operands, bf16-rounded noise draws). Fixed to be safe for S == 0.
# ----------------------------------------------------------------------------
def _reference_forward(xs, ys, W, noise, log_r, *, lambd, noise_std,
                       mxu_dtype=jnp.bfloat16):
    lp_scale = 0.5 * lambd
    pr_scale = 0.5 * (1.0 - lambd)
    W_m = W.astype(mxu_dtype)

    def energy(x):
        resid = jnp.dot(x.astype(mxu_dtype), W_m,
                        preferred_element_type=jnp.float32) - ys
        return (lp_scale * jnp.sum(resid * resid, axis=1)
                + pr_scale * jnp.sum(x * x, axis=1))

    x_curr = xs
    e_curr = energy(x_curr)
    e0 = e_curr
    for i in range(noise.shape[0]):
        n_i = noise[i].astype(jnp.bfloat16).astype(jnp.float32)
        x_prop = x_curr + noise_std * n_i
        e_prop = energy(x_prop)
        acc = log_r[i][:, 0] < (e_curr - e_prop)
        x_curr = jnp.where(acc[:, None], x_prop, x_curr)
        e_curr = jnp.where(acc, e_prop, e_curr)
    return x_curr, e_curr - e0


if __name__ == "__main__":
    # Small, deterministic problem setup: 2 batch tiles of 16 rows, 8 MH steps
    # fused as 2 grid iterations of 4 steps each.
    B, D, Dy = 32, 32, 8
    METR_STEPS = 8
    LAMBD = 0.5
    NOISE_STD = 0.1

    key = jax.random.PRNGKey(0)
    k_x, k_y, k_w, k_n, k_r = jax.random.split(key, 5)

    xs = jax.random.normal(k_x, (B, D), dtype=jnp.float32)
    ys = jax.random.normal(k_y, (B, Dy), dtype=jnp.float32)       # conditioning c
    W = 0.1 * jax.random.normal(k_w, (D, Dy), dtype=jnp.float32)  # synthetic posterior weights

    # Pre-generated randomness (proposal noise and uniform acceptance draws),
    # mirroring torch.randn_like / torch.rand_like inside the loop.
    noise = jax.random.normal(k_n, (METR_STEPS, B, D), dtype=jnp.float32)
    r = jax.random.uniform(k_r, (METR_STEPS, B, 1), dtype=jnp.float32)

    zs, e = mcmc_layer_forward(xs, ys, W, noise, r,
                               lambd=LAMBD, noise_std=NOISE_STD,
                               steps_per_iter=4)
    zs = jax.block_until_ready(zs)
    e = jax.block_until_ready(e)

    zs_ref, e_ref = _reference_forward(xs, ys, W, noise, jnp.log(r),
                                       lambd=LAMBD, noise_std=NOISE_STD)
    assert zs.shape == (B, D) and e.shape == (B,)
    assert jnp.allclose(zs, zs_ref, atol=1e-4, rtol=1e-4)
    assert jnp.allclose(e, e_ref, atol=1e-4, rtol=1e-4)

    print("KERNEL_OK")
</pallas_src>

<mosaic_0001>
module attributes {stable_mosaic.version = 11 : i64} {
  func.func @_mcmc_kernel(%arg0: i32, %arg1: i32, %arg2: memref<16x32xf32, #tpu.memory_space<vmem>>, %arg3: memref<16x8xf32, #tpu.memory_space<vmem>>, %arg4: memref<32x8xf32, #tpu.memory_space<vmem>>, %arg5: memref<4x16x32xbf16, #tpu.memory_space<vmem>>, %arg6: memref<4x16x1xf32, #tpu.memory_space<vmem>>, %arg7: memref<16x32xf32, #tpu.memory_space<vmem>>, %arg8: memref<16x128xf32, #tpu.memory_space<vmem>>, %arg9: memref<16x32xf32, #tpu.memory_space<vmem>>, %arg10: memref<16x1xf32, #tpu.memory_space<vmem>>, %arg11: memref<16x1xf32, #tpu.memory_space<vmem>>) attributes {dimension_semantics = [#tpu.dimension_semantics<parallel>, #tpu.dimension_semantics<arbitrary>], iteration_bounds = array<i64: 2, 2>, scalar_prefetch = 0 : i64, scratch_operands = 3 : i64, tpu.core_type = #tpu.core_type<tc>, window_params = [{transform_indices = @transform_0, window_bounds = array<i64: 16, 32>}, {transform_indices = @transform_1, window_bounds = array<i64: 16, 8>}, {pipeline_mode = #tpu.pipeline_mode<synchronous>, transform_indices = @transform_2, window_bounds = array<i64: 32, 8>}, {transform_indices = @transform_3, window_bounds = array<i64: 4, 16, 32>}, {transform_indices = @transform_4, window_bounds = array<i64: 4, 16, 1>}, {transform_indices = @transform_5, window_bounds = array<i64: 16, 32>}, {transform_indices = @transform_6, window_bounds = array<i64: 16, 128>}]} {
    %c0 = arith.constant 0 : index
    %c0_0 = arith.constant 0 : index
    %0 = vector.load %arg3[%c0, %c0_0] : memref<16x8xf32, #tpu.memory_space<vmem>>, vector<16x8xf32>
    %c0_1 = arith.constant 0 : index
    %c0_2 = arith.constant 0 : index
    %1 = vector.load %arg4[%c0_1, %c0_2] : memref<32x8xf32, #tpu.memory_space<vmem>>, vector<32x8xf32>
    %2 = arith.truncf %1 : vector<32x8xf32> to vector<32x8xbf16>
    %c0_i32 = arith.constant 0 : i32
    %3 = arith.cmpi eq, %arg1, %c0_i32 : i32
    %4 = arith.extui %3 : i1 to i32
    %c0_i32_3 = arith.constant 0 : i32
    %5 = arith.cmpi ne, %4, %c0_i32_3 : i32
    scf.if %5 {
      %c0_54 = arith.constant 0 : index
      %c0_55 = arith.constant 0 : index
      %133 = vector.load %arg2[%c0_54, %c0_55] : memref<16x32xf32, #tpu.memory_space<vmem>>, vector<16x32xf32>
      %134 = arith.truncf %133 : vector<16x32xf32> to vector<16x32xbf16>
      %cst_56 = arith.constant dense<0.000000e+00> : vector<16x8xf32>
      %135 = tpu.matmul %134, %2, %cst_56 {dimension_numbers = #tpu.dot_dimension_numbers<[1], [0], [0], [1], [0, 0, 1, 1], [], []>} : vector<16x32xbf16>, vector<32x8xbf16>, vector<16x8xf32> -> vector<16x8xf32>
      %136 = arith.subf %135, %0 : vector<16x8xf32>
      %137 = arith.mulf %136, %136 : vector<16x8xf32>
      %cst_57 = arith.constant dense<0.000000e+00> : vector<16xf32>
      %138 = vector.multi_reduction <add>, %137, %cst_57 [1] : vector<16x8xf32> to vector<16xf32>
      %139 = vector.shape_cast %138 : vector<16xf32> to vector<16x1xf32>
      %cst_58 = arith.constant 2.500000e-01 : f32
      %140 = vector.broadcast %cst_58 : f32 to vector<16x1xf32>
      %141 = arith.mulf %140, %139 : vector<16x1xf32>
      %142 = arith.mulf %133, %133 : vector<16x32xf32>
      %cst_59 = arith.constant dense<0.000000e+00> : vector<16xf32>
      %143 = vector.multi_reduction <add>, %142, %cst_59 [1] : vector<16x32xf32> to vector<16xf32>
      %144 = vector.shape_cast %143 : vector<16xf32> to vector<16x1xf32>
      %cst_60 = arith.constant 2.500000e-01 : f32
      %145 = vector.broadcast %cst_60 : f32 to vector<16x1xf32>
      %146 = arith.mulf %145, %144 : vector<16x1xf32>
      %147 = arith.addf %141, %146 : vector<16x1xf32>
      %c0_61 = arith.constant 0 : index
      %c0_62 = arith.constant 0 : index
      %148 = vector.load %arg9[%c0_61, %c0_62] : memref<16x32xf32, #tpu.memory_space<vmem>>, vector<16x32xf32>
      tpu.vector_store %arg9[%c0_61, %c0_62], %133 {strides = array<i32>} : memref<16x32xf32, #tpu.memory_space<vmem>>, vector<16x32xf32>,
      %c0_63 = arith.constant 0 : index
      %c0_64 = arith.constant 0 : index
      %149 = vector.load %arg10[%c0_63, %c0_64] : memref<16x1xf32, #tpu.memory_space<vmem>>, vector<16x1xf32>
      tpu.vector_store %arg10[%c0_63, %c0_64], %147 {strides = array<i32>} : memref<16x1xf32, #tpu.memory_space<vmem>>, vector<16x1xf32>,
      %c0_65 = arith.constant 0 : index
      %c0_66 = arith.constant 0 : index
      %150 = vector.load %arg11[%c0_65, %c0_66] : memref<16x1xf32, #tpu.memory_space<vmem>>, vector<16x1xf32>
      tpu.vector_store %arg11[%c0_65, %c0_66], %147 {strides = array<i32>} : memref<16x1xf32, #tpu.memory_space<vmem>>, vector<16x1xf32>,
    } else {
    }
    %c0_4 = arith.constant 0 : index
    %c0_5 = arith.constant 0 : index
    %6 = vector.load %arg9[%c0_4, %c0_5] : memref<16x32xf32, #tpu.memory_space<vmem>>, vector<16x32xf32>
    %c0_6 = arith.constant 0 : index
    %c0_7 = arith.constant 0 : index
    %7 = vector.load %arg11[%c0_6, %c0_7] : memref<16x1xf32, #tpu.memory_space<vmem>>, vector<16x1xf32>
    %c0_i32_8 = arith.constant 0 : i32
    %8 = arith.index_cast %c0_i32_8 : i32 to index
    %c0_9 = arith.constant 0 : index
    %c0_10 = arith.constant 0 : index
    %9 = vector.load %arg5[%8, %c0_9, %c0_10] : memref<4x16x32xbf16, #tpu.memory_space<vmem>>, vector<1x16x32xbf16>
    %10 = vector.shape_cast %9 : vector<1x16x32xbf16> to vector<16x32xbf16>
    %11 = arith.extf %10 : vector<16x32xbf16> to vector<16x32xf32>
    %cst = arith.constant 1.000000e-01 : f32
    %12 = vector.broadcast %cst : f32 to vector<16x32xf32>
    %13 = arith.mulf %12, %11 : vector<16x32xf32>
    %14 = arith.addf %6, %13 : vector<16x32xf32>
    %15 = arith.truncf %14 : vector<16x32xf32> to vector<16x32xbf16>
    %cst_11 = arith.constant dense<0.000000e+00> : vector<16x8xf32>
    %16 = tpu.matmul %15, %2, %cst_11 {dimension_numbers = #tpu.dot_dimension_numbers<[1], [0], [0], [1], [0, 0, 1, 1], [], []>} : vector<16x32xbf16>, vector<32x8xbf16>, vector<16x8xf32> -> vector<16x8xf32>
    %17 = arith.subf %16, %0 : vector<16x8xf32>
    %18 = arith.mulf %17, %17 : vector<16x8xf32>
    %cst_12 = arith.constant dense<0.000000e+00> : vector<16xf32>
    %19 = vector.multi_reduction <add>, %18, %cst_12 [1] : vector<16x8xf32> to vector<16xf32>
    %20 = vector.shape_cast %19 : vector<16xf32> to vector<16x1xf32>
    %cst_13 = arith.constant 2.500000e-01 : f32
    %21 = vector.broadcast %cst_13 : f32 to vector<16x1xf32>
    %22 = arith.mulf %21, %20 : vector<16x1xf32>
    %23 = arith.mulf %14, %14 : vector<16x32xf32>
    %cst_14 = arith.constant dense<0.000000e+00> : vector<16xf32>
    %24 = vector.multi_reduction <add>, %23, %cst_14 [1] : vector<16x32xf32> to vector<16xf32>
    %25 = vector.shape_cast %24 : vector<16xf32> to vector<16x1xf32>
    %cst_15 = arith.constant 2.500000e-01 : f32
    %26 = vector.broadcast %cst_15 : f32 to vector<16x1xf32>
    %27 = arith.mulf %26, %25 : vector<16x1xf32>
    %28 = arith.addf %22, %27 : vector<16x1xf32>
    %29 = arith.index_cast %c0_i32_8 : i32 to index
    %c0_16 = arith.constant 0 : index
    %c0_17 = arith.constant 0 : index
    %30 = vector.load %arg6[%29, %c0_16, %c0_17] : memref<4x16x1xf32, #tpu.memory_space<vmem>>, vector<1x16x1xf32>
    %31 = vector.shape_cast %30 : vector<1x16x1xf32> to vector<16x1xf32>
    %32 = arith.subf %7, %28 : vector<16x1xf32>
    %33 = arith.cmpf olt, %31, %32 : vector<16x1xf32>
    %34 = vector.shape_cast %33 : vector<16x1xi1> to vector<16x1xi1>
    %35 = vector.broadcast %34 : vector<16x1xi1> to vector<16x32xi1>
    %36 = arith.select %35, %14, %6 : vector<16x32xi1>, vector<16x32xf32>
    %37 = arith.select %33, %28, %7 : vector<16x1xi1>, vector<16x1xf32>
    %c1_i32 = arith.constant 1 : i32
    %38 = arith.index_cast %c1_i32 : i32 to index
    %c0_18 = arith.constant 0 : index
    %c0_19 = arith.constant 0 : index
    %39 = vector.load %arg5[%38, %c0_18, %c0_19] : memref<4x16x32xbf16, #tpu.memory_space<vmem>>, vector<1x16x32xbf16>
    %40 = vector.shape_cast %39 : vector<1x16x32xbf16> to vector<16x32xbf16>
    %41 = arith.extf %40 : vector<16x32xbf16> to vector<16x32xf32>
    %cst_20 = arith.constant 1.000000e-01 : f32
    %42 = vector.broadcast %cst_20 : f32 to vector<16x32xf32>
    %43 = arith.mulf %42, %41 : vector<16x32xf32>
    %44 = arith.addf %36, %43 : vector<16x32xf32>
    %45 = arith.truncf %44 : vector<16x32xf32> to vector<16x32xbf16>
    %cst_21 = arith.constant dense<0.000000e+00> : vector<16x8xf32>
    %46 = tpu.matmul %45, %2, %cst_21 {dimension_numbers = #tpu.dot_dimension_numbers<[1], [0], [0], [1], [0, 0, 1, 1], [], []>} : vector<16x32xbf16>, vector<32x8xbf16>, vector<16x8xf32> -> vector<16x8xf32>
    %47 = arith.subf %46, %0 : vector<16x8xf32>
    %48 = arith.mulf %47, %47 : vector<16x8xf32>
    %cst_22 = arith.constant dense<0.000000e+00> : vector<16xf32>
    %49 = vector.multi_reduction <add>, %48, %cst_22 [1] : vector<16x8xf32> to vector<16xf32>
    %50 = vector.shape_cast %49 : vector<16xf32> to vector<16x1xf32>
    %cst_23 = arith.constant 2.500000e-01 : f32
    %51 = vector.broadcast %cst_23 : f32 to vector<16x1xf32>
    %52 = arith.mulf %51, %50 : vector<16x1xf32>
    %53 = arith.mulf %44, %44 : vector<16x32xf32>
    %cst_24 = arith.constant dense<0.000000e+00> : vector<16xf32>
    %54 = vector.multi_reduction <add>, %53, %cst_24 [1] : vector<16x32xf32> to vector<16xf32>
    %55 = vector.shape_cast %54 : vector<16xf32> to vector<16x1xf32>
    %cst_25 = arith.constant 2.500000e-01 : f32
    %56 = vector.broadcast %cst_25 : f32 to vector<16x1xf32>
    %57 = arith.mulf %56, %55 : vector<16x1xf32>
    %58 = arith.addf %52, %57 : vector<16x1xf32>
    %59 = arith.index_cast %c1_i32 : i32 to index
    %c0_26 = arith.constant 0 : index
    %c0_27 = arith.constant 0 : index
    %60 = vector.load %arg6[%59, %c0_26, %c0_27] : memref<4x16x1xf32, #tpu.memory_space<vmem>>, vector<1x16x1xf32>
    %61 = vector.shape_cast %60 : vector<1x16x1xf32> to vector<16x1xf32>
    %62 = arith.subf %37, %58 : vector<16x1xf32>
    %63 = arith.cmpf olt, %61, %62 : vector<16x1xf32>
    %64 = vector.shape_cast %63 : vector<16x1xi1> to vector<16x1xi1>
    %65 = vector.broadcast %64 : vector<16x1xi1> to vector<16x32xi1>
    %66 = arith.select %65, %44, %36 : vector<16x32xi1>, vector<16x32xf32>
    %67 = arith.select %63, %58, %37 : vector<16x1xi1>, vector<16x1xf32>
    %c2_i32 = arith.constant 2 : i32
    %68 = arith.index_cast %c2_i32 : i32 to index
    %c0_28 = arith.constant 0 : index
    %c0_29 = arith.constant 0 : index
    %69 = vector.load %arg5[%68, %c0_28, %c0_29] : memref<4x16x32xbf16, #tpu.memory_space<vmem>>, vector<1x16x32xbf16>
    %70 = vector.shape_cast %69 : vector<1x16x32xbf16> to vector<16x32xbf16>
    %71 = arith.extf %70 : vector<16x32xbf16> to vector<16x32xf32>
    %cst_30 = arith.constant 1.000000e-01 : f32
    %72 = vector.broadcast %cst_30 : f32 to vector<16x32xf32>
    %73 = arith.mulf %72, %71 : vector<16x32xf32>
    %74 = arith.addf %66, %73 : vector<16x32xf32>
    %75 = arith.truncf %74 : vector<16x32xf32> to vector<16x32xbf16>
    %cst_31 = arith.constant dense<0.000000e+00> : vector<16x8xf32>
    %76 = tpu.matmul %75, %2, %cst_31 {dimension_numbers = #tpu.dot_dimension_numbers<[1], [0], [0], [1], [0, 0, 1, 1], [], []>} : vector<16x32xbf16>, vector<32x8xbf16>, vector<16x8xf32> -> vector<16x8xf32>
    %77 = arith.subf %76, %0 : vector<16x8xf32>
    %78 = arith.mulf %77, %77 : vector<16x8xf32>
    %cst_32 = arith.constant dense<0.000000e+00> : vector<16xf32>
    %79 = vector.multi_reduction <add>, %78, %cst_32 [1] : vector<16x8xf32> to vector<16xf32>
    %80 = vector.shape_cast %79 : vector<16xf32> to vector<16x1xf32>
    %cst_33 = arith.constant 2.500000e-01 : f32
    %81 = vector.broadcast %cst_33 : f32 to vector<16x1xf32>
    %82 = arith.mulf %81, %80 : vector<16x1xf32>
    %83 = arith.mulf %74, %74 : vector<16x32xf32>
    %cst_34 = arith.constant dense<0.000000e+00> : vector<16xf32>
    %84 = vector.multi_reduction <add>, %83, %cst_34 [1] : vector<16x32xf32> to vector<16xf32>
    %85 = vector.shape_cast %84 : vector<16xf32> to vector<16x1xf32>
    %cst_35 = arith.constant 2.500000e-01 : f32
    %86 = vector.broadcast %cst_35 : f32 to vector<16x1xf32>
    %87 = arith.mulf %86, %85 : vector<16x1xf32>
    %88 = arith.addf %82, %87 : vector<16x1xf32>
    %89 = arith.index_cast %c2_i32 : i32 to index
    %c0_36 = arith.constant 0 : index
    %c0_37 = arith.constant 0 : index
    %90 = vector.load %arg6[%89, %c0_36, %c0_37] : memref<4x16x1xf32, #tpu.memory_space<vmem>>, vector<1x16x1xf32>
    %91 = vector.shape_cast %90 : vector<1x16x1xf32> to vector<16x1xf32>
    %92 = arith.subf %67, %88 : vector<16x1xf32>
    %93 = arith.cmpf olt, %91, %92 : vector<16x1xf32>
    %94 = vector.shape_cast %93 : vector<16x1xi1> to vector<16x1xi1>
    %95 = vector.broadcast %94 : vector<16x1xi1> to vector<16x32xi1>
    %96 = arith.select %95, %74, %66 : vector<16x32xi1>, vector<16x32xf32>
    %97 = arith.select %93, %88, %67 : vector<16x1xi1>, vector<16x1xf32>
    %c3_i32 = arith.constant 3 : i32
    %98 = arith.index_cast %c3_i32 : i32 to index
    %c0_38 = arith.constant 0 : index
    %c0_39 = arith.constant 0 : index
    %99 = vector.load %arg5[%98, %c0_38, %c0_39] : memref<4x16x32xbf16, #tpu.memory_space<vmem>>, vector<1x16x32xbf16>
    %100 = vector.shape_cast %99 : vector<1x16x32xbf16> to vector<16x32xbf16>
    %101 = arith.extf %100 : vector<16x32xbf16> to vector<16x32xf32>
    %cst_40 = arith.constant 1.000000e-01 : f32
    %102 = vector.broadcast %cst_40 : f32 to vector<16x32xf32>
    %103 = arith.mulf %102, %101 : vector<16x32xf32>
    %104 = arith.addf %96, %103 : vector<16x32xf32>
    %105 = arith.truncf %104 : vector<16x32xf32> to vector<16x32xbf16>
    %cst_41 = arith.constant dense<0.000000e+00> : vector<16x8xf32>
    %106 = tpu.matmul %105, %2, %cst_41 {dimension_numbers = #tpu.dot_dimension_numbers<[1], [0], [0], [1], [0, 0, 1, 1], [], []>} : vector<16x32xbf16>, vector<32x8xbf16>, vector<16x8xf32> -> vector<16x8xf32>
    %107 = arith.subf %106, %0 : vector<16x8xf32>
    %108 = arith.mulf %107, %107 : vector<16x8xf32>
    %cst_42 = arith.constant dense<0.000000e+00> : vector<16xf32>
    %109 = vector.multi_reduction <add>, %108, %cst_42 [1] : vector<16x8xf32> to vector<16xf32>
    %110 = vector.shape_cast %109 : vector<16xf32> to vector<16x1xf32>
    %cst_43 = arith.constant 2.500000e-01 : f32
    %111 = vector.broadcast %cst_43 : f32 to vector<16x1xf32>
    %112 = arith.mulf %111, %110 : vector<16x1xf32>
    %113 = arith.mulf %104, %104 : vector<16x32xf32>
    %cst_44 = arith.constant dense<0.000000e+00> : vector<16xf32>
    %114 = vector.multi_reduction <add>, %113, %cst_44 [1] : vector<16x32xf32> to vector<16xf32>
    %115 = vector.shape_cast %114 : vector<16xf32> to vector<16x1xf32>
    %cst_45 = arith.constant 2.500000e-01 : f32
    %116 = vector.broadcast %cst_45 : f32 to vector<16x1xf32>
    %117 = arith.mulf %116, %115 : vector<16x1xf32>
    %118 = arith.addf %112, %117 : vector<16x1xf32>
    %119 = arith.index_cast %c3_i32 : i32 to index
    %c0_46 = arith.constant 0 : index
    %c0_47 = arith.constant 0 : index
    %120 = vector.load %arg6[%119, %c0_46, %c0_47] : memref<4x16x1xf32, #tpu.memory_space<vmem>>, vector<1x16x1xf32>
    %121 = vector.shape_cast %120 : vector<1x16x1xf32> to vector<16x1xf32>
    %122 = arith.subf %97, %118 : vector<16x1xf32>
    %123 = arith.cmpf olt, %121, %122 : vector<16x1xf32>
    %124 = vector.shape_cast %123 : vector<16x1xi1> to vector<16x1xi1>
    %125 = vector.broadcast %124 : vector<16x1xi1> to vector<16x32xi1>
    %126 = arith.select %125, %104, %96 : vector<16x32xi1>, vector<16x32xf32>
    %127 = arith.select %123, %118, %97 : vector<16x1xi1>, vector<16x1xf32>
    %c4_i32 = arith.constant 4 : i32
    %c0_48 = arith.constant 0 : index
    %c0_49 = arith.constant 0 : index
    %128 = vector.load %arg9[%c0_48, %c0_49] : memref<16x32xf32, #tpu.memory_space<vmem>>, vector<16x32xf32>
    tpu.vector_store %arg9[%c0_48, %c0_49], %126 {strides = array<i32>} : memref<16x32xf32, #tpu.memory_space<vmem>>, vector<16x32xf32>,
    %c0_50 = arith.constant 0 : index
    %c0_51 = arith.constant 0 : index
    %129 = vector.load %arg11[%c0_50, %c0_51] : memref<16x1xf32, #tpu.memory_space<vmem>>, vector<16x1xf32>
    tpu.vector_store %arg11[%c0_50, %c0_51], %127 {strides = array<i32>} : memref<16x1xf32, #tpu.memory_space<vmem>>, vector<16x1xf32>,
    %c1_i32_52 = arith.constant 1 : i32
    %130 = arith.cmpi eq, %arg1, %c1_i32_52 : i32
    %131 = arith.extui %130 : i1 to i32
    %c0_i32_53 = arith.constant 0 : i32
    %132 = arith.cmpi ne, %131, %c0_i32_53 : i32
    scf.if %132 {
      %c0_54 = arith.constant 0 : index
      %c0_55 = arith.constant 0 : index
      %133 = vector.load %arg7[%c0_54, %c0_55] : memref<16x32xf32, #tpu.memory_space<vmem>>, vector<16x32xf32>
      tpu.vector_store %arg7[%c0_54, %c0_55], %126 {strides = array<i32>} : memref<16x32xf32, #tpu.memory_space<vmem>>, vector<16x32xf32>,
      %c0_56 = arith.constant 0 : index
      %c0_57 = arith.constant 0 : index
      %134 = vector.load %arg10[%c0_56, %c0_57] : memref<16x1xf32, #tpu.memory_space<vmem>>, vector<16x1xf32>
      %135 = arith.subf %127, %134 : vector<16x1xf32>
      %136 = vector.shape_cast %135 : vector<16x1xf32> to vector<16x1xf32>
      %137 = vector.broadcast %136 : vector<16x1xf32> to vector<16x128xf32>
      %c0_58 = arith.constant 0 : index
      %c0_59 = arith.constant 0 : index
      %138 = vector.load %arg8[%c0_58, %c0_59] : memref<16x128xf32, #tpu.memory_space<vmem>>, vector<16x128xf32>
      tpu.vector_store %arg8[%c0_58, %c0_59], %137 {strides = array<i32>} : memref<16x128xf32, #tpu.memory_space<vmem>>, vector<16x128xf32>,
    } else {
    }
    return
  }
  func.func @transform_0(%arg0: i32, %arg1: i32) -> (i32, i32) {
    %c0_i32 = arith.constant 0 : i32
    %c0_i32_0 = arith.constant 0 : i32
    return %arg0, %c0_i32 : i32, i32
  }
  func.func @transform_1(%arg0: i32, %arg1: i32) -> (i32, i32) {
    %c0_i32 = arith.constant 0 : i32
    %c0_i32_0 = arith.constant 0 : i32
    return %arg0, %c0_i32 : i32, i32
  }
  func.func @transform_2(%arg0: i32, %arg1: i32) -> (i32, i32) {
    %c0_i32 = arith.constant 0 : i32
    %c0_i32_0 = arith.constant 0 : i32
    %c0_i32_1 = arith.constant 0 : i32
    return %c0_i32, %c0_i32_0 : i32, i32
  }
  func.func @transform_3(%arg0: i32, %arg1: i32) -> (i32, i32, i32) {
    %c0_i32 = arith.constant 0 : i32
    %c0_i32_0 = arith.constant 0 : i32
    return %arg1, %arg0, %c0_i32 : i32, i32, i32
  }
  func.func @transform_4(%arg0: i32, %arg1: i32) -> (i32, i32, i32) {
    %c0_i32 = arith.constant 0 : i32
    %c0_i32_0 = arith.constant 0 : i32
    return %arg1, %arg0, %c0_i32 : i32, i32, i32
  }
  func.func @transform_5(%arg0: i32, %arg1: i32) -> (i32, i32) {
    %c0_i32 = arith.constant 0 : i32
    %c0_i32_0 = arith.constant 0 : i32
    return %arg0, %c0_i32 : i32, i32
  }
  func.func @transform_6(%arg0: i32, %arg1: i32) -> (i32, i32) {
    %c0_i32 = arith.constant 0 : i32
    %c0_i32_0 = arith.constant 0 : i32
    return %arg0, %c0_i32 : i32, i32
  }
}

</mosaic_0001>

<bundles_post_ra>
// kernel: tpu_custom_call.1
= control target key start
LH: loop header
LB: loop body
LE: loop exit
PB: predicated region body
PF: predicated region fallthrough
CT: control target
= control target key end

     0   :  { %s1986_s0 = inlined_call_operand.vmem [shape: f32[32,32], index: 0, kind: input, shape index: {}]   ;;  %s1987_s1 = inlined_call_operand.vmem [shape: f32[32,8], index: 1, kind: input, shape index: {}]   ;;  %s1988_s2 = inlined_call_operand.vmem [shape: f32[32,8], index: 2, kind: input, shape index: {}]   ;;  %s1989_s3 = inlined_call_operand.vmem [shape: bf16[8,32,32], index: 3, kind: input, shape index: {}]   ;;  %s1990_s4 = inlined_call_operand.vmem [shape: f32[8,32,1], index: 4, kind: input, shape index: {}]   ;;  %s1991_s5 = inlined_call_operand.hbm [shape: f32[32,32], index: 5, kind: output, shape index: {0}]   ;;  %s1992_s6 = inlined_call_operand.hbm [shape: f32[32,128], index: 6, kind: output, shape index: {1}]  }
   0x1   :  { %1996 = sst [smem:[#allocation17_spill]] %s1988_s2 }
   0x2   :  { %1997 = sst [smem:[#allocation18_spill]] %s1989_s3 }
   0x3   :  { %1998 = sst [smem:[#allocation19_spill]] %s1990_s4 }
   0x4   :  { %12 = vsyncpa [#allocation8], 0 }
   0x5   :  { %14 = vsyncpa [#allocation8 + $0x1], 0 }
   0x6   :  { %15 = vsyncpa [#allocation10], 0 }
   0x7   :  { %17 = vsyncpa [#allocation10 + $0x1], 0  ;;  %s1619_s21 = smov 0   ;;  %s1621_s22 = smov 0  }
   0x8   :  { %s1623_s23 = smov 0   ;;  %s1625_s24 = smov 0  }
   0x9   :  { %s1627_s25 = smov 0   ;;  %s1629_s26 = smov 0  }
   0xa   :  { %s1631_s27 = smov 0   ;;  %s1633_s28 = smov 0  }
   0xb   :  { %s1635_s29 = smov 0   ;;  %s1637_s30 = smov 0  }
   0xc LB: > { %1999 = sst [smem:[#allocation13_spill]] %s1568_s29  ;;  %s1203_s7 = sadd.s32 4294967295, %s1572_s30   ;;  %s1572_s30 = sphi %s1637_s30, %s23_s30   ;;  %s1568_s29 = sphi %s1635_s29, %s2012_s29   ;;  %s1564_s28 = sphi %s1633_s28, %s2019_s28   ;;  %s1560_s27 = sphi %s1631_s27, %s2010_s27   ;;  %s1556_s26 = sphi %s1629_s26, %s2018_s26   ;;  %s1552_s25 = sphi %s1627_s25, %s2017_s25   ;;  %s1548_s24 = sphi %s1625_s24, %s2016_s24   ;;  %s1544_s23 = sphi %s1623_s23, %s2015_s23   ;;  %s1540_s22 = sphi %s1621_s22, %s2014_s22   ;;  %s1536_s21 = sphi %s1619_s21, %s2013_s21  }
   0xd   : > { %s1204_s8 = sadd.s32 4294967294, %s1572_s30   ;;  %s32_s9 = sadd.s32 1, %s1564_s28 }
   0xe   : > { %s35_s10 = sadd.s32 1, %s1568_s29  ;;  %p33_p0 = scmp.ge.s32.totalorder %s32_s9, 2 }
   0xf   : > { %s117_s11 = sadd.s32 1, %s1552_s25  ;;  %p124_p1 = scmp.ne.s32.totalorder %s1552_s25, %s1548_s24 }
  0x10   : > { %p125_p2 = scmp.eq.s32.totalorder %s1572_s30, 0  ;;  %s2021_s9 = smov (%p33_p0, %s32_s9), 0 }
  0x11   : > { %2000 = sst [smem:[#allocation14_spill]] %s2021_s9  ;;  %s2023_s10 = smov (!%p33_p0, %s35_s10), %s1568_s29 }
  0x12   : > { %s112_s12 = ssub.s32 %s1564_s28, %s2021_s9  ;;  %p1682_p3 = por %p125_p2, %p124_p1 }
  0x13   : > { %p37_p4 = scmp.ge.s32.totalorder %s2023_s10, 2  ;;  %s171_s14 = sadd.s32 1, %s1544_s23 }
  0x14   : > { %p181_p5 = scmp.ne.s32.totalorder %s1544_s23, %s1540_s22  ;;  %p182_p6 = scmp.eq.s32.totalorder %s1203_s7, 3 }
  0x15   : > { %s2025_s10 = smov (%p37_p4, %s2023_s10), 0  ;;  %p187_p8 = scmp.ne.s32.totalorder %s1540_s22, %s1536_s21 }
  0x16   : > { %2002 = sst [smem:[#allocation15_spill]] %s2025_s10  ;;  %p1691_p7 = por %p182_p6, %p181_p5 }
  0x17   : > { %s113_s16 = ssub.s32 %s1568_s29, %s2025_s10  ;;  %p188_p9 = scmp.eq.s32.totalorder %s1204_s8, 3 }
  0x18   : > { %s114_s17 = sor.u32 %s113_s16, %s112_s12  ;;  %p169_p10 = scmp.eq.s32.totalorder %s113_s16, 0 }
  0x19   : > { %p115_p11 = scmp.eq.s32.totalorder %s114_s17, 0  ;;  %p1699_p12 = por %p188_p9, %p187_p8 }
  0x1a   : > { %s1704_s19 = scalar_select %p169_p10, %s1544_s23, %s171_s14  }
  0x1b   : > { %s1707_s20 = scalar_select %p115_p11, %s1552_s25, %s117_s11  }
  0x1c   : > { %p1206_p13 = scmp.ge.s32.totalorder %s1572_s30, 4 }
  0x1d   : > { %2005 = sst [smem:[#allocation16_spill]] %s1707_s20 }
  0x1e   : > { %233 = sbr.rel (%p1206_p13) target bundleno = 61 (0x3d), region = 20 }
  0x23   : > { %254 = sbr.rel (!%p1682_p3) target bundleno = 47 (0x2f), region = 32  ;;  %s256_s7 = sand.u32 (%p1682_p3), 1, %s1552_s25  }
  0x24   : > { %s1209_s8 = sshll.u32 (%p1682_p3), %s1568_s29, 1  ;;  %s1207_s12 = sshll.u32 (%p1682_p3), %s256_s7, 5 }
  0x25   : > { %s1253_s16 = sshll.u32 (%p1682_p3), %s1564_s28, 4  ;;  %s2006_s3 = sld [smem:[#allocation18_spill]] (%p1682_p3) }
  0x26   : > { %s262_s17 = sadd.s32 (%p1682_p3), %s1253_s16, %s1209_s8  ;;  %s258_s20 = scalar_lea.vmem (%p1682_p3), [#allocation5], %s1207_s12 }
  0x27   : > { %s1211_s10 = sshll.u32 (%p1682_p3), %s262_s17, 2 }
  0x2b   : > { %s264_s11 = scalar_lea.vmem %s2006_s3, %s1211_s10 }
  0x2c   : > { %v281_v0 = vld [vmem:[%s264_s11] sm:$0xff]   ;;  %v285_v1 = vld [vmem:[%s264_s11 + $0x10] sm:$0xff]  }
  0x2d   : > { %v289_v2 = vld [vmem:[%s264_s11 + $0x20] sm:$0xff]   ;;  %282 = vst [vmem:[%s258_s20] sm:$0xff] %v281_v0   ;;  %286 = vst [vmem:[%s258_s20 + $0x8] sm:$0xff] %v285_v1   ;;  %v293_v3 = vld [vmem:[%s264_s11 + $0x30] sm:$0xff]  }
  0x2e   : > { %290 = vst [vmem:[%s258_s20 + $0x10] sm:$0xff] %v289_v2   ;;  %294 = vst [vmem:[%s258_s20 + $0x18] sm:$0xff] %v293_v3  }
  0x2f PF: > { %336 = sbr.rel (!%p1682_p3) target bundleno = 61 (0x3d), region = 73  ;;  %s338_s7 = sand.u32 (%p1682_p3), 1, %s1552_s25  }
  0x30   : > { %s1214_s8 = sshll.u32 (%p1682_p3), %s1568_s29, 1  ;;  %s1212_s9 = sshll.u32 (%p1682_p3), %s338_s7, 6 }
  0x31   : > { %s1254_s10 = sshll.u32 (%p1682_p3), %s1564_s28, 4  ;;  %s2007_s4 = sld [smem:[#allocation19_spill]] (%p1682_p3) }
  0x32   : > { %s344_s16 = sadd.s32 (%p1682_p3), %s1254_s10, %s1214_s8  ;;  %s340_s20 = scalar_lea.vmem (%p1682_p3), [#allocation6], %s1212_s9 }
  0x33   : > { %s1216_s17 = sshll.u32 (%p1682_p3), %s344_s16, 3 }
  0x37   : > { %s346_s3 = scalar_lea.vmem %s2007_s4, %s1216_s17 }
  0x38   : > { %v389_v4 = vld [vmem:[%s346_s3] sm:$0xff]  ;;  %v391_v5 = vld [vmem:[%s346_s3 + $0x8] sm:$0xff] }
  0x39   : > { %v393_v6 = vld [vmem:[%s346_s3 + $0x20] sm:$0xff]  ;;  %390 = vst [vmem:[%s340_s20] sm:$0xff] %v389_v4  ;;  %392 = vst [vmem:[%s340_s20 + $0x8] sm:$0xff] %v391_v5  ;;  %v395_v7 = vld [vmem:[%s346_s3 + $0x28] sm:$0xff] }
  0x3a   : > { %394 = vst [vmem:[%s340_s20 + $0x10] sm:$0xff] %v393_v6  ;;  %v397_v8 = vld [vmem:[%s346_s3 + $0x40] sm:$0xff]  ;;  %v399_v9 = vld [vmem:[%s346_s3 + $0x48] sm:$0xff]  ;;  %396 = vst [vmem:[%s340_s20 + $0x18] sm:$0xff] %v395_v7 }
  0x3b   : > { %398 = vst [vmem:[%s340_s20 + $0x20] sm:$0xff] %v397_v8  ;;  %400 = vst [vmem:[%s340_s20 + $0x28] sm:$0xff] %v399_v9  ;;  %v401_v10 = vld [vmem:[%s346_s3 + $0x60] sm:$0xff]  ;;  %v403_v11 = vld [vmem:[%s346_s3 + $0x68] sm:$0xff] }
  0x3c   : > { %402 = vst [vmem:[%s340_s20 + $0x30] sm:$0xff] %v401_v10  ;;  %404 = vst [vmem:[%s340_s20 + $0x38] sm:$0xff] %v403_v11 }
  0x3d PF: > { %p1217_p0 = scmp.ge.s32.totalorder %s1572_s30, 1  ;;  %p409_p1 = scmp.lt.s32.totalorder %s1572_s30, 5 }
  0x3f   : > { %p410_p2 = pnand %p1217_p0, %p409_p1 }
  0x40   : > { %s416_s13 = sand.u32 (!%p410_p2), 1, %s1548_s24   ;;  %s1730_s11 = sand.u32 (!%p410_p2), 1, %s1540_s22  }
  0x41   : > { %413 = sbr.rel (%p410_p2) target bundleno = 2541 (0x9ed), region = 111  ;;  %s2008_s2 = sld [smem:[#allocation17_spill]] (!%p410_p2) }
  0x42   : > { %s1218_s17 = sshll.u32 (!%p410_p2), %s416_s13, 5  ;;  %s1219_s14 = sshll.u32 (!%p410_p2), %s416_s13, 6 }
  0x43   : > { %s1220_s24 = sshll.u32 (!%p410_p2), %s1730_s11, 4  ;;  %s1222_s7 = sshll.u32 (!%p410_p2), %s1560_s27, 1 }
  0x44   : > { %p472_p3 = scmp.lt.s32.totalorder (!%p410_p2), %s1222_s7, 3  ;;  %s1760_s12 = scalar_lea.vmem (!%p410_p2), [#allocation5], %s1218_s17 }
  0x45   : > { %s1762_s20 = scalar_lea.vmem (!%p410_p2), [#allocation6], %s1219_s14  ;;  %s1766_s29 = scalar_lea.vmem (!%p410_p2), [#allocation9], %s1220_s24 }
  0x46   : > { %s2027_s7 = smov (!%p472_p3, %s1222_s7), 3  ;;  %p1226_p4 = scmp.ne.s32.totalorder %s1556_s26, 0 }
  0x47   : > { %v492_v12 = vld [vmem:[%s2008_s2] sm:$0xff]  ;;  %v493_v13 = vld [vmem:[%s2008_s2 + $0x8] sm:$0xff]  ;;  %v494_v14 = vld [vmem:[%s2008_s2 + $0x10] sm:$0xff]  ;;  %s1223_s8 = sshll.u32 %s2027_s7, 3 }
  0x48   : > { %v495_v15 = vld [vmem:[%s2008_s2 + $0x18] sm:$0xff]  ;;  %v1744_v16 = vpack.c.bf16 %v493_v13, %v492_v12  ;;  %s475_s10 = scalar_lea.vmem %s1986_s0, %s1223_s8  ;;  %s481_s13 = scalar_lea.vmem %s1987_s1, %s1223_s8 }
  0x49   : > { %v1746_v17 = vpack.c.bf16 %v495_v15, %v494_v14  ;;  %v1756_v18 = vld [vmem:[%s481_s13] sm:$0xff]  ;;  %v1758_v19 = vld [vmem:[%s481_s13 + $0x8] sm:$0xff]  ;;  %s1764_s2 = scalar_lea.vmem [#allocation7], %s1220_s24  ;;  %501 = sbr.rel (%p1226_p4) target bundleno = 432 (0x1b0), region = 123 }
  0x4e   : > { %v502_v20 = vld [vmem:[%s475_s10] sm:$0xff]  ;;  %v503_v21 = vld [vmem:[%s475_s10 + $0x8] sm:$0xff]  ;;  %vm505_vm0 = vcmask 261120   ;;  %v1574_v22 = vmov 0.0   ;;  %vm1575_vm1 = vmmov 0   ;;  %vm554_vm2 = vcmask 64512  }
  0x4f   : > { %1291 = vmatprep.subr.bf16.mxu0 %v1574_v22  ;;  %1295 = vmatprep.mubr.msk.bf16.mxu0 %vm1575_vm1, %v1574_v22  ;;  %575 = vst.msk [vmem:[#allocation2] sm:$0xff] %vm505_vm0, %v502_v20  ;;  %576 = vst.msk [vmem:[#allocation2 + $0x8] sm:$0xff] %vm505_vm0, %v503_v21  ;;  %v504_v23 = vpack.c.bf16 %v503_v21, %v502_v20  ;;  %v563_v24 = vmul.f32 %v502_v20, %v502_v20  ;;  %vm577_vm3 = vcmask 7168  }
  0x50   : > { %1292 = vmatpush3.bf16.msra.mxu0 %v1746_v17  ;;  %v564_v26 = vmul.f32 %v503_v21, %v503_v21 }
  0x51   : > { %1293 = vmatprep.subr.bf16.mxu0 %v1574_v22  ;;  %v565_v25 = vsel %vm505_vm0, %v563_v24, 0.0 }
  0x52   : > { %566 = vadd.xlane.f32.xlu1 %v565_v25  ;;  %v568_v27 = vsel %vm505_vm0, %v564_v26, 0.0 }
  0x54   : > { %1294 = vmatpush3.bf16.msra.mxu0 %v1744_v16 }
  0x56   : > { %569 = vadd.xlane.f32.xlu1 %v568_v27 }
  0x57   : > { %1296 = vmatmul.mubr.msk.bf16.vlgmr.msra.gmra.mxu0 %vm505_vm0, %v504_v23 }
  0xdb   : > { %v567_v38 = vpop.xlane.xlu1 %566 }
  0xdc   : > { %v571_v39 = vmul.f32 0.25, %v567_v38 }
  0xdf   : > { %v570_v41 = vpop.xlane.xlu1 %569 }
  0xe0   : > { %v572_v44 = vmul.f32 0.25, %v570_v41 }
 0x117   : > { %v543_v28 = vpop.f32.mrf.mxu0 }
 0x118   : > { %v550_v29 = vsub.f32 %v543_v28, %v1756_v18 }
 0x119   : > { %v1297_v30 = vpop.f32.mrf.mxu0 }
 0x11a   : > { %v552_v31 = vmul.f32 %v550_v29, %v550_v29 }
 0x11b   : > { %v546_v32 = vpop.f32.mrf.mxu0 }
 0x11c   : > { %v551_v33 = vsub.f32 %v546_v32, %v1758_v19  ;;  %v555_v34 = vsel %vm554_vm2, %v552_v31, 0.0 }
 0x11d   : > { %556 = vadd.xlane.f32.xlu0 %v555_v34  ;;  %v1298_v35 = vpop.f32.mrf.mxu0 }
 0x11e   : > { %v553_v36 = vmul.f32 %v551_v33, %v551_v33 }
 0x120   : > { %v558_v37 = vsel %vm554_vm2, %v553_v36, 0.0 }
 0x121   : > { %559 = vadd.xlane.f32.xlu0 %v558_v37 }
 0x1a6   : > { %v557_v40 = vpop.xlane.xlu0 %556 }
 0x1a7   : > { %v561_v42 = vmul.f32 0.25, %v557_v40 }
 0x1a9   : > { %v573_v43 = vadd.f32 %v571_v39, %v561_v42 }
 0x1aa   : > { %v560_v45 = vpop.xlane.xlu0 %559 }
 0x1ab   : > { %578 = vst.msk [vmem:[#allocation3] sm:$0xff] %vm577_vm3, %v573_v43  ;;  %580 = vst.msk [vmem:[#allocation4] sm:$0xff] %vm577_vm3, %v573_v43  ;;  %v562_v46 = vmul.f32 0.25, %v560_v45 }
 0x1ad   : > { %v574_v47 = vadd.f32 %v572_v44, %v562_v46 }
 0x1af   : > { %579 = vst.msk [vmem:[#allocation3 + $0x8] sm:$0xff] %vm577_vm3, %v574_v47  ;;  %581 = vst.msk [vmem:[#allocation4 + $0x8] sm:$0xff] %vm577_vm3, %v574_v47 }
 0x1b0 PF: > { %v1258_v48 = vld [vmem:[%s1760_s12] sm:$0xff]   ;;  %v1576_v49 = vmov 0.0   ;;  %vm1577_vm4 = vmmov 0   ;;  %v1783_v52 = vld [vmem:[#allocation2] sm:$0xff]  ;;  %v1785_v53 = vld [vmem:[#allocation2 + $0x8] sm:$0xff]  ;;  %vm595_vm5 = vcmask 261120  }
 0x1b1   : > { %1299 = vmatprep.subr.bf16.mxu0 %v1576_v49  ;;  %1303 = vmatprep.mubr.msk.bf16.mxu0 %vm1577_vm4, %v1576_v49  ;;  %v1259_v50 = vunpack.c.l.bf16 %v1258_v48  ;;  %v1260_v51 = vunpack.c.h.bf16 %v1258_v48  ;;  %vm644_vm6 = vcmask 64512   ;;  %v1578_v9 = vmov 0   ;;  %v665_v23 = vld [vmem:[%s1762_s20] sm:$0xff]  ;;  %v666_v30 = vld [vmem:[%s1762_s20 + $0x8] sm:$0xff]  ;;  %p1244_p5 = scmp.ne.s32.totalorder %s1556_s26, 1 }
 0x1b2   : > { %1300 = vmatpush3.bf16.msra.mxu0 %v1746_v17  ;;  %1307 = vmatprep.subr.bf16.mxu1 %v1576_v49  ;;  %v584_v15 = vld [vmem:[#allocation4] sm:$0xff]  ;;  %v1273_v34 = vld [vmem:[%s1760_s12 + $0x8] sm:$0xff]   ;;  %vm984_vm3 = vcmask 7168  }
 0x1b3   : > { %1301 = vmatprep.subr.bf16.mxu0 %v1576_v49  ;;  %v590_v54 = vmul.f32 0.1, %v1259_v50  ;;  %v591_v55 = vmul.f32 0.1, %v1260_v51  ;;  %1308 = vmatpush3.bf16.msra.mxu1 %v1746_v17  ;;  %v1263_v35 = vunpack.c.l.bf16 %v1273_v34  ;;  %v1264_v36 = vunpack.c.h.bf16 %v1273_v34 }
 0x1b4   : > { %1309 = vmatprep.subr.bf16.mxu1 %v1576_v49  ;;  %1311 = vmatprep.mubr.msk.bf16.mxu1 %vm1577_vm4, %v1576_v49 }
 0x1b5   : > { %v1794_v56 = vadd.f32 %v590_v54, %v1783_v52  ;;  %v1797_v57 = vadd.f32 %v591_v55, %v1785_v53  ;;  %1431 = vset.pattern.permute.xlu0 %v1578_v9  ;;  %1432 = vset.pattern.permute.xlu1 %v1578_v9  ;;  %v690_v38 = vmul.f32 0.1, %v1263_v35  ;;  %v691_v39 = vmul.f32 0.1, %v1264_v36 }
 0x1b6   : > { %1302 = vmatpush3.bf16.msra.mxu0 %v1744_v16  ;;  %v585_v26 = vld [vmem:[#allocation4 + $0x8] sm:$0xff] }
 0x1b7   : > { %v594_v58 = vpack.c.bf16 %v1797_v57, %v1794_v56  ;;  %1310 = vmatpush3.bf16.msra.mxu1 %v1744_v16  ;;  %1315 = vmatprep.subr.bf16.mxu0 %v1576_v49  ;;  %v653_v59 = vmul.f32 %v1794_v56, %v1794_v56  ;;  %v654_v61 = vmul.f32 %v1797_v57, %v1797_v57 }
 0x1b8   : > { %1323 = vmatprep.subr.bf16.mxu1 %v1576_v49 }
 0x1b9   : > { %1304 = vmatmul.mubr.msk.bf16.vlgmr.msra.gmra.mxu0 %vm595_vm5, %v594_v58  ;;  %v655_v60 = vsel %vm595_vm5, %v653_v59, 0.0  ;;  %v658_v62 = vsel %vm595_vm5, %v654_v61, 0.0 }
 0x1ba   : > { %1316 = vmatpush3.bf16.msra.mxu0 %v1746_v17  ;;  %1319 = vmatprep.mubr.msk.bf16.mxu0 %vm1577_vm4, %v1576_v49 }
 0x1bb   : > { %1317 = vmatprep.subr.bf16.mxu0 %v1576_v49  ;;  %656 = vadd.xlane.f32.xlu1 %v655_v60 }
 0x1be   : > { %1318 = vmatpush3.bf16.msra.mxu0 %v1744_v16 }
 0x1bf   : > { %659 = vadd.xlane.f32.xlu1 %v658_v62 }
 0x244   : > { %v657_v10 = vpop.xlane.xlu1 %656 }
 0x245   : > { %v661_v11 = vmul.f32 0.25, %v657_v10 }
 0x248   : > { %v660_v13 = vpop.xlane.xlu1 %659 }
 0x249   : > { %v662_v21 = vmul.f32 0.25, %v660_v13  ;;  %v1274_v13 = vld [vmem:[%s1760_s12 + $0x10] sm:$0xff]  }
 0x279   : > { %v633_v63 = vpop.f32.mrf.mxu0 }
 0x27a   : > { %v640_v0 = vsub.f32 %v633_v63, %v1756_v18 }
 0x27b   : > { %v1305_v1 = vpop.f32.mrf.mxu0 }
 0x27c   : > { %v642_v2 = vmul.f32 %v640_v0, %v640_v0  ;;  %v1232_v1 = vld [vmem:[%s1762_s20 + $0x10] sm:$0xff] }
 0x27d   : > { %v636_v3 = vpop.f32.mrf.mxu0 }
 0x27e   : > { %v641_v4 = vsub.f32 %v636_v3, %v1758_v19  ;;  %v645_v5 = vsel %vm644_vm6, %v642_v2, 0.0 }
 0x27f   : > { %646 = vadd.xlane.f32.xlu0 %v645_v5  ;;  %v1306_v6 = vpop.f32.mrf.mxu0 }
 0x280   : > { %v643_v7 = vmul.f32 %v641_v4, %v641_v4 }
 0x282   : > { %v648_v8 = vsel %vm644_vm6, %v643_v7, 0.0 }
 0x283   : > { %649 = vadd.xlane.f32.xlu0 %v648_v8  ;;  %v1233_v8 = vld [vmem:[%s1762_s20 + $0x18] sm:$0xff] }
 0x308   : > { %v647_v12 = vpop.xlane.xlu0 %646 }
 0x309   : > { %v651_v14 = vmul.f32 0.25, %v647_v12 }
 0x30b   : > { %v663_v20 = vadd.f32 %v661_v11, %v651_v14  ;;  %v1267_v14 = vunpack.c.l.bf16 %v1274_v13 }
 0x30c   : > { %v650_v22 = vpop.xlane.xlu0 %649 }
 0x30d   : > { %v667_v24 = vsub.f32 %v584_v15, %v663_v20  ;;  %v652_v25 = vmul.f32 0.25, %v650_v22 }
 0x30f   : > { %v664_v27 = vadd.f32 %v662_v21, %v652_v25  ;;  %vm669_vm7 = vcmp.lt.f32.partialorder %v665_v23, %v667_v24  ;;  %v789_v21 = vmul.f32 0.1, %v1267_v14 }
 0x310   : > { %v671_v28 = vsel %vm669_vm7, 1, %v1578_v9  ;;  %v683_v29 = vsel %vm669_vm7, %v663_v20, %v584_v15  ;;  %v1268_v15 = vunpack.c.h.bf16 %v1274_v13 }
 0x311   : > { %v668_v31 = vsub.f32 %v585_v26, %v664_v27  ;;  %674 = vperm.xlu0 %1431, %v671_v28  }
 0x312   : > { %v790_v22 = vmul.f32 0.1, %v1268_v15 }
 0x313   : > { %vm670_vm8 = vcmp.lt.f32.partialorder %v666_v30, %v668_v31 }
 0x314   : > { %v672_v32 = vsel %vm670_vm8, 1, %v1578_v9  ;;  %v684_v33 = vsel %vm670_vm8, %v664_v27, %v585_v26 }
 0x315   : > { %677 = vperm.xlu1 %1432, %v672_v32  }
 0x38c   : > { %v675_v37 = vpop.permute.xlu0 %674 }
 0x38d   : > { %vm679_vm9 = vcmp.eq.s32.totalorder %v675_v37, 1 }
 0x38e   : > { %v681_v40 = vsel %vm679_vm9, %v1794_v56, %v1783_v52 }
 0x38f   : > { %v692_v43 = vadd.f32 %v690_v38, %v681_v40 }
 0x390   : > { %v678_v41 = vpop.permute.xlu1 %677 }
 0x391   : > { %vm680_vm10 = vcmp.eq.s32.totalorder %v678_v41, 1  ;;  %v751_v54 = vmul.f32 %v692_v43, %v692_v43 }
 0x392   : > { %v682_v42 = vsel %vm680_vm10, %v1797_v57, %v1785_v53 }
 0x393   : > { %v693_v44 = vadd.f32 %v691_v39, %v682_v42  ;;  %v753_v56 = vsel %vm595_vm5, %v751_v54, 0.0 }
 0x395   : > { %v694_v45 = vpack.c.bf16 %v693_v44, %v692_v43 }
 0x397   : > { %1312 = vmatmul.mubr.msk.bf16.vlgmr.msra.gmra.mxu1 %vm595_vm5, %v694_v45 }
 0x398   : > { %1324 = vmatpush3.bf16.msra.mxu1 %v1746_v17  ;;  %1327 = vmatprep.mubr.msk.bf16.mxu1 %vm1577_vm4, %v1576_v49 }
 0x399   : > { %1325 = vmatprep.subr.bf16.mxu1 %v1576_v49 }
 0x39c   : > { %1326 = vmatpush3.bf16.msra.mxu1 %v1744_v16  ;;  %v752_v16 = vmul.f32 %v693_v44, %v693_v44 }
 0x39e   : > { %v756_v57 = vsel %vm595_vm5, %v752_v16, 0.0 }
 0x457   : > { %v732_v46 = vpop.f32.mrf.mxu1 }
 0x458   : > { %v739_v47 = vsub.f32 %v732_v46, %v1756_v18 }
 0x459   : > { %v1313_v48 = vpop.f32.mrf.mxu1 }
 0x45a   : > { %v741_v50 = vmul.f32 %v739_v47, %v739_v47 }
 0x45b   : > { %v735_v51 = vpop.f32.mrf.mxu1 }
 0x45c   : > { %v740_v52 = vsub.f32 %v735_v51, %v1758_v19  ;;  %v743_v53 = vsel %vm644_vm6, %v741_v50, 0.0  ;;  %v1237_v51 = vld [vmem:[%s1762_s20 + $0x20] sm:$0xff] }
 0x45d   : > { %744 = vadd.xlane.f32.xlu1 %v743_v53  ;;  %v1314_v17 = vpop.f32.mrf.mxu1 }
 0x45e   : > { %v742_v55 = vmul.f32 %v740_v52, %v740_v52 }
 0x460   : > { %v746_v49 = vsel %vm644_vm6, %v742_v55, 0.0 }
 0x461   : > { %754 = vadd.xlane.f32.xlu1 %v753_v56  ;;  %747 = vadd.xlane.f32.xlu0 %v746_v49  ;;  %v1238_v49 = vld [vmem:[%s1762_s20 + $0x28] sm:$0xff] }
 0x465   : > { %757 = vadd.xlane.f32.xlu1 %v756_v57 }
 0x4e6   : > { %v745_v58 = vpop.xlane.xlu1 %744 }
 0x4e7   : > { %v749_v60 = vmul.f32 0.25, %v745_v58 }
 0x4ea   : > { %v755_v59 = vpop.xlane.xlu1 %754  ;;  %v748_v62 = vpop.xlane.xlu0 %747 }
 0x4eb   : > { %v759_v61 = vmul.f32 0.25, %v755_v59  ;;  %v750_v3 = vmul.f32 0.25, %v748_v62  ;;  %v1275_v59 = vld [vmem:[%s1760_s12 + $0x18] sm:$0xff]  }
 0x4ed   : > { %v761_v63 = vadd.f32 %v759_v61, %v749_v60  ;;  %v1271_v60 = vunpack.c.l.bf16 %v1275_v59  ;;  %v1272_v61 = vunpack.c.h.bf16 %v1275_v59 }
 0x4ee   : > { %v758_v0 = vpop.xlane.xlu1 %757 }
 0x4ef   : > { %v766_v2 = vsub.f32 %v683_v29, %v761_v63  ;;  %v760_v4 = vmul.f32 0.25, %v758_v0  ;;  %v889_v0 = vmul.f32 0.1, %v1272_v61 }
 0x4f1   : > { %v762_v5 = vadd.f32 %v760_v4, %v750_v3  ;;  %vm768_vm11 = vcmp.lt.f32.partialorder %v1232_v1, %v766_v2 }
 0x4f2   : > { %v770_v6 = vsel %vm768_vm11, 1, %v1578_v9  ;;  %v782_v7 = vsel %vm768_vm11, %v761_v63, %v683_v29  ;;  %v888_v63 = vmul.f32 0.1, %v1271_v60 }
 0x4f3   : > { %v767_v10 = vsub.f32 %v684_v33, %v762_v5  ;;  %773 = vperm.xlu1 %1432, %v770_v6  }
 0x4f5   : > { %vm769_vm12 = vcmp.lt.f32.partialorder %v1233_v8, %v767_v10 }
 0x4f6   : > { %v771_v11 = vsel %vm769_vm12, 1, %v1578_v9  ;;  %v783_v12 = vsel %vm769_vm12, %v762_v5, %v684_v33 }
 0x4f7   : > { %776 = vperm.xlu0 %1431, %v771_v11  }
 0x56e   : > { %v774_v20 = vpop.permute.xlu1 %773 }
 0x56f   : > { %vm778_vm13 = vcmp.eq.s32.totalorder %v774_v20, 1 }
 0x570   : > { %v780_v23 = vsel %vm778_vm13, %v692_v43, %v681_v40 }
 0x571   : > { %v791_v26 = vadd.f32 %v789_v21, %v780_v23 }
 0x572   : > { %v777_v24 = vpop.permute.xlu0 %776 }
 0x573   : > { %vm779_vm14 = vcmp.eq.s32.totalorder %v777_v24, 1  ;;  %v850_v36 = vmul.f32 %v791_v26, %v791_v26 }
 0x574   : > { %v781_v25 = vsel %vm779_vm14, %v693_v44, %v682_v42 }
 0x575   : > { %v792_v27 = vadd.f32 %v790_v22, %v781_v25  ;;  %v852_v39 = vsel %vm595_vm5, %v850_v36, 0.0 }
 0x577   : > { %v793_v28 = vpack.c.bf16 %v792_v27, %v791_v26  ;;  %v851_v41 = vmul.f32 %v792_v27, %v792_v27 }
 0x579   : > { %1320 = vmatmul.mubr.msk.bf16.vlgmr.msra.gmra.mxu0 %vm595_vm5, %v793_v28  ;;  %v855_v42 = vsel %vm595_vm5, %v851_v41, 0.0 }
 0x639   : > { %v831_v29 = vpop.f32.mrf.mxu0 }
 0x63a   : > { %v838_v30 = vsub.f32 %v831_v29, %v1756_v18 }
 0x63b   : > { %v1321_v31 = vpop.f32.mrf.mxu0 }
 0x63c   : > { %v840_v32 = vmul.f32 %v838_v30, %v838_v30  ;;  %v1242_v31 = vld [vmem:[%s1762_s20 + $0x30] sm:$0xff] }
 0x63d   : > { %v834_v33 = vpop.f32.mrf.mxu0 }
 0x63e   : > { %v839_v34 = vsub.f32 %v834_v33, %v1758_v19  ;;  %v842_v35 = vsel %vm644_vm6, %v840_v32, 0.0 }
 0x63f   : > { %843 = vadd.xlane.f32.xlu1 %v842_v35  ;;  %v1322_v37 = vpop.f32.mrf.mxu0 }
 0x640   : > { %v841_v38 = vmul.f32 %v839_v34, %v839_v34 }
 0x642   : > { %v845_v40 = vsel %vm644_vm6, %v841_v38, 0.0  ;;  %v1243_v38 = vld [vmem:[%s1762_s20 + $0x38] sm:$0xff] }
 0x643   : > { %853 = vadd.xlane.f32.xlu1 %v852_v39  ;;  %846 = vadd.xlane.f32.xlu0 %v845_v40 }
 0x647   : > { %856 = vadd.xlane.f32.xlu1 %v855_v42 }
 0x6c8   : > { %v844_v43 = vpop.xlane.xlu1 %843 }
 0x6c9   : > { %v848_v45 = vmul.f32 0.25, %v844_v43 }
 0x6cc   : > { %v854_v44 = vpop.xlane.xlu1 %853  ;;  %v847_v47 = vpop.xlane.xlu0 %846 }
 0x6cd   : > { %v858_v46 = vmul.f32 0.25, %v854_v44  ;;  %v849_v53 = vmul.f32 0.25, %v847_v47 }
 0x6cf   : > { %v860_v48 = vadd.f32 %v858_v46, %v848_v45 }
 0x6d0   : > { %v857_v50 = vpop.xlane.xlu1 %856 }
 0x6d1   : > { %v865_v52 = vsub.f32 %v782_v7, %v860_v48  ;;  %v859_v54 = vmul.f32 0.25, %v857_v50 }
 0x6d3   : > { %v861_v17 = vadd.f32 %v859_v54, %v849_v53  ;;  %vm867_vm15 = vcmp.lt.f32.partialorder %v1237_v51, %v865_v52 }
 0x6d4   : > { %v869_v55 = vsel %vm867_vm15, 1, %v1578_v9  ;;  %v881_v56 = vsel %vm867_vm15, %v860_v48, %v782_v7 }
 0x6d5   : > { %v866_v16 = vsub.f32 %v783_v12, %v861_v17  ;;  %872 = vperm.xlu1 %1432, %v869_v55  }
 0x6d7   : > { %vm868_vm0 = vcmp.lt.f32.partialorder %v1238_v49, %v866_v16 }
 0x6d8   : > { %v870_v57 = vsel %vm868_vm0, 1, %v1578_v9  ;;  %v882_v58 = vsel %vm868_vm0, %v861_v17, %v783_v12 }
 0x6d9   : > { %875 = vperm.xlu0 %1431, %v870_v57  }
 0x750   : > { %v873_v62 = vpop.permute.xlu1 %872 }
 0x751   : > { %vm877_vm1 = vcmp.eq.s32.totalorder %v873_v62, 1 }
 0x752   : > { %v879_v1 = vsel %vm877_vm1, %v791_v26, %v780_v23 }
 0x753   : > { %v890_v4 = vadd.f32 %v888_v63, %v879_v1 }
 0x754   : > { %v876_v2 = vpop.permute.xlu0 %875 }
 0x755   : > { %vm878_vm2 = vcmp.eq.s32.totalorder %v876_v2, 1  ;;  %v949_v15 = vmul.f32 %v890_v4, %v890_v4 }
 0x756   : > { %v880_v3 = vsel %vm878_vm2, %v792_v27, %v781_v25 }
 0x757   : > { %v891_v5 = vadd.f32 %v889_v0, %v880_v3  ;;  %v951_v22 = vsel %vm595_vm5, %v949_v15, 0.0 }
 0x759   : > { %v892_v6 = vpack.c.bf16 %v891_v5, %v890_v4  ;;  %v950_v24 = vmul.f32 %v891_v5, %v891_v5 }
 0x75b   : > { %1328 = vmatmul.mubr.msk.bf16.vlgmr.msra.gmra.mxu1 %vm595_vm5, %v892_v6 }
 0x81b   : > { %v930_v7 = vpop.f32.mrf.mxu1 }
 0x81c   : > { %v937_v8 = vsub.f32 %v930_v7, %v1756_v18  ;;  %v954_v18 = vsel %vm595_vm5, %v950_v24, 0.0 }
 0x81d   : > { %v1329_v10 = vpop.f32.mrf.mxu1 }
 0x81e   : > { %v939_v11 = vmul.f32 %v937_v8, %v937_v8 }
 0x81f   : > { %v933_v12 = vpop.f32.mrf.mxu1 }
 0x820   : > { %v938_v13 = vsub.f32 %v933_v12, %v1758_v19  ;;  %v941_v14 = vsel %vm644_vm6, %v939_v11, 0.0 }
 0x821   : > { %942 = vadd.xlane.f32.xlu1 %v941_v14  ;;  %v1330_v20 = vpop.f32.mrf.mxu1 }
 0x822   : > { %v940_v21 = vmul.f32 %v938_v13, %v938_v13 }
 0x824   : > { %v944_v23 = vsel %vm644_vm6, %v940_v21, 0.0 }
 0x825   : > { %952 = vadd.xlane.f32.xlu1 %v951_v22  ;;  %945 = vadd.xlane.f32.xlu0 %v944_v23 }
 0x829   : > { %955 = vadd.xlane.f32.xlu1 %v954_v18 }
 0x8aa   : > { %v943_v25 = vpop.xlane.xlu1 %942 }
 0x8ab   : > { %v947_v26 = vmul.f32 0.25, %v943_v25 }
 0x8ae   : > { %v953_v19 = vpop.xlane.xlu1 %952  ;;  %v946_v28 = vpop.xlane.xlu0 %945 }
 0x8af   : > { %v957_v27 = vmul.f32 0.25, %v953_v19  ;;  %v948_v33 = vmul.f32 0.25, %v946_v28 }
 0x8b1   : > { %v959_v29 = vadd.f32 %v957_v27, %v947_v26 }
 0x8b2   : > { %v956_v30 = vpop.xlane.xlu1 %955 }
 0x8b3   : > { %v964_v32 = vsub.f32 %v881_v56, %v959_v29  ;;  %v958_v34 = vmul.f32 0.25, %v956_v30 }
 0x8b5   : > { %v960_v35 = vadd.f32 %v958_v34, %v948_v33  ;;  %vm966_vm4 = vcmp.lt.f32.partialorder %v1242_v31, %v964_v32 }
 0x8b6   : > { %v968_v36 = vsel %vm966_vm4, 1, %v1578_v9  ;;  %v980_v37 = vsel %vm966_vm4, %v959_v29, %v881_v56 }
 0x8b7   : > { %v965_v39 = vsub.f32 %v882_v58, %v960_v35  ;;  %985 = vst.msk [vmem:[#allocation4] sm:$0xff] %vm984_vm3, %v980_v37  ;;  %971 = vperm.xlu0 %1431, %v968_v36  }
 0x8b9   : > { %vm967_vm6 = vcmp.lt.f32.partialorder %v1243_v38, %v965_v39 }
 0x8ba   : > { %v969_v40 = vsel %vm967_vm6, 1, %v1578_v9  ;;  %v981_v41 = vsel %vm967_vm6, %v960_v35, %v882_v58 }
 0x8bb   : > { %986 = vst.msk [vmem:[#allocation4 + $0x8] sm:$0xff] %vm984_vm3, %v981_v41  ;;  %974 = vperm.xlu1 %1432, %v969_v40  }
 0x932   : > { %v972_v42 = vpop.permute.xlu0 %971 }
 0x933   : > { %vm976_vm7 = vcmp.eq.s32.totalorder %v972_v42, 1 }
 0x934   : > { %v978_v43 = vsel %vm976_vm7, %v890_v4, %v879_v1 }
 0x935   : > { %982 = vst.msk [vmem:[#allocation2] sm:$0xff] %vm595_vm5, %v978_v43  ;;  %990 = sbr.rel (%p1244_p5) target bundleno = 2494 (0x9be), region = 127 }
 0x936   : > { %v975_v44 = vpop.permute.xlu1 %974 }
 0x937   : > { %vm977_vm8 = vcmp.eq.s32.totalorder %v975_v44, 1 }
 0x938   : > { %v979_v45 = vsel %vm977_vm8, %v891_v5, %v880_v3 }
 0x939   : > { %983 = vst.msk [vmem:[#allocation2 + $0x8] sm:$0xff] %vm595_vm5, %v979_v45 }
 0x93a   : > { %v993_v46 = vld [vmem:[#allocation3] sm:$0xff]  ;;  %v994_v9 = vld [vmem:[#allocation3 + $0x8] sm:$0xff]  ;;  %991 = vst.msk [vmem:[%s1764_s2] sm:$0xff] %vm595_vm5, %v978_v43  ;;  %992 = vst.msk [vmem:[%s1764_s2 + $0x8] sm:$0xff] %vm595_vm5, %v979_v45  ;;  %v1579_v47 = vmov 0  }
 0x93b   : > { %1433 = vset.pattern.permute.xlu0 %v1579_v47  ;;  %v995_v48 = vsub.f32 %v980_v37, %v993_v46  ;;  %v996_v50 = vsub.f32 %v981_v41, %v994_v9 }
 0x93d   : > { %999 = vperm.xlu0 %1433, %v995_v48  }
 0x941   : > { %1004 = vperm.xlu0 %1433, %v996_v50  }
 0x9b8   : > { %v1000_v51 = vpop.permute.xlu0 %999 }
 0x9b9   : > { %1007 = vst [vmem:[%s1766_s29] sm:$0xff] %v1000_v51 }
 0x9bc   : > { %v1005_v52 = vpop.permute.xlu0 %1004 }
 0x9bd   : > { %1008 = vst [vmem:[%s1766_s29 + $0x8] sm:$0xff] %v1005_v52 }
 0x9be PF: > { %s1255_s4 = sshll.u32 %s1560_s27, 8  ;;  %s1028_s24 = sshll.u32 %s1764_s2, 4  ;;  %s1890_s24 = int_to_ptr.vmem [resolvable:$true] %s1028_s24 }
 0x9bf   : > { %s1887_s14 = scalar_lea.hbm %s1991_s5, %s1255_s4  ;;  %s1010_s7 = scalar_lea.sflag [#allocation8], %s1730_s11 }
 0x9c0   : > { %s1434_s8 = scalar_lea.vmem %s1890_s24, 256  ;;  %s1580_s3 = smov [#allocation7]  }
 0x9c1   : > { %p1435_p6 = scmp.ne.s32.totalorder %s1890_s24, %s1434_s8  ;;  %s1438_s9 = sshll.u32 %s1580_s3, 4  ;;  %s1439_s9 = int_to_ptr.vmem [resolvable:$false] %s1438_s9 }
 0x9c2   : > { %s1440_s10 = scalar_lea.vmem %s1439_s9, 512  ;;  %p1441_p10 = scmp.lt.s32.totalorder %s1890_s24, %s1439_s9 }
 0x9c3   : > { %p1436_p8 = pnand %p1435_p6, %p1691_p7  ;;  %p1442_p11 = scmp.lt.s32.totalorder %s1440_s10, %s1434_s8 }
 0x9c5   : > { %p1437_p9 = pneg %p1436_p8  ;;  %p1443_p13 = por %p1442_p11, %p1441_p10 }
 0x9c7   : > { %p1444_p0 = pnand %p1443_p13, %p1437_p9 }
 0x9c9   : > { %1447 = shalt.err (!%p1444_p0)
}
 0x9ca   : > { %s1448_s2 = scalar_lea.hbm %s1887_s14, 256  ;;  %s1452_s12 = scalar_lea.hbm %s1991_s5, 512 }
 0x9cb   : > { %p1449_p1 = scmp.ne.s32.totalorder %s1887_s14, %s1448_s2  ;;  %p1453_p4 = scmp.lt.s32.totalorder %s1887_s14, %s1991_s5 }
 0x9cc   : > { %p1454_p5 = scmp.lt.s32.totalorder %s1452_s12, %s1448_s2 }
 0x9cd   : > { %p1450_p2 = pnand %p1449_p1, %p1691_p7 }
 0x9ce   : > { %p1455_p6 = por %p1454_p5, %p1453_p4 }
 0x9cf   : > { %p1451_p3 = pneg %p1450_p2 }
 0x9d1   : > { %p1456_p8 = pnand %p1455_p6, %p1451_p3 }
 0x9d3   : > { %1459 = shalt.err (!%p1456_p8)
}
 0x9d4   : > { %s1581_s17 = smov 128   ;;  %s1582_s8 = smov 8  }
 0x9d5   : > { %1331 = dma.vmem_to_hbm [thread:$0]  (%p1691_p7), %s1890_s24, 256, %s1887_s14, %s1010_s7, %s1581_s17, %s1581_s17, %s1582_s8  }
 0x9d6   : > { %s1923_s10 = scalar_lea.hbm %s1992_s6, %s1255_s4  ;;  %s1044_s2 = sshll.u32 %s1766_s29, 4  ;;  %s1926_s2 = int_to_ptr.vmem [resolvable:$true] %s1044_s2 }
 0x9d7   : > { %s1015_s16 = scalar_lea.sflag [#allocation10], %s1730_s11  ;;  %s1460_s13 = scalar_lea.vmem %s1926_s2, 256 }
 0x9d8   : > { %p1461_p9 = scmp.ne.s32.totalorder %s1926_s2, %s1460_s13  ;;  %s1583_s12 = smov [#allocation9]  }
 0x9d9   : > { %s1464_s14 = sshll.u32 %s1583_s12, 4  ;;  %s1465_s14 = int_to_ptr.vmem [resolvable:$false] %s1464_s14 }
 0x9da   : > { %p1462_p10 = pnand %p1461_p9, %p1691_p7  ;;  %s1466_s27 = scalar_lea.vmem %s1465_s14, 512 }
 0x9db   : > { %p1467_p13 = scmp.lt.s32.totalorder %s1926_s2, %s1465_s14  ;;  %p1468_p0 = scmp.lt.s32.totalorder %s1466_s27, %s1460_s13 }
 0x9dc   : > { %p1463_p11 = pneg %p1462_p10 }
 0x9dd   : > { %p1469_p1 = por %p1468_p0, %p1467_p13 }
 0x9df   : > { %p1470_p2 = pnand %p1469_p1, %p1463_p11 }
 0x9e1   : > { %1473 = shalt.err (!%p1470_p2)
}
 0x9e2   : > { %s1474_s29 = scalar_lea.hbm %s1923_s10, 256  ;;  %s1478_s24 = scalar_lea.hbm %s1992_s6, 512 }
 0x9e3   : > { %p1475_p3 = scmp.ne.s32.totalorder %s1923_s10, %s1474_s29  ;;  %p1479_p6 = scmp.lt.s32.totalorder %s1923_s10, %s1992_s6 }
 0x9e4   : > { %p1480_p8 = scmp.lt.s32.totalorder %s1478_s24, %s1474_s29 }
 0x9e5   : > { %p1476_p4 = pnand %p1475_p3, %p1691_p7 }
 0x9e6   : > { %p1481_p9 = por %p1480_p8, %p1479_p6 }
 0x9e7   : > { %p1477_p5 = pneg %p1476_p4 }
 0x9e9   : > { %p1482_p10 = pnand %p1481_p9, %p1477_p5 }
 0x9eb   : > { %1485 = shalt.err (!%p1482_p10)
}
 0x9ec   : > { %1332 = dma.vmem_to_hbm [thread:$0]  (%p1691_p7), %s1926_s2, 256, %s1923_s10, %s1015_s16, %s1581_s17, %s1581_s17, %s1582_s8  }
 0x9ed PF: > { %p1342_p11 = scmp.ge.s32.totalorder %s1572_s30, 2  ;;  %s1059_s26 = sand.u32 1, %s1536_s21  }
 0x9ee   : > { %s1060_s3 = scalar_lea.sflag [#allocation8], %s1059_s26 }
 0x9ef   : > { %p1336_p13 = pnand %p1342_p11, %p1699_p12 }
 0x9f1   : > { %p1337_p0 = pneg %p1336_p13 }
 0x9f3   : > { %1527 = dma.done.wait (%p1337_p0), %s1060_s3, 256  }
 0x9f4   : > { %1529 = vsyncadd (%p1337_p0), %s1060_s3, 4294967040  ;;  %s1069_s9 = scalar_lea.sflag [#allocation10], %s1059_s26 }
 0x9f5   : > { %1531 = dma.done.wait (%p1337_p0), %s1069_s9, 256  }
 0x9f6   : > { %1533 = vsyncadd (%p1337_p0), %s1069_s9, 4294967040  ;;  %s23_s30 = sadd.s32 1, %s1572_s30   ;;  %s2009_s15 = sld [smem:[#allocation16_spill]] }
 0x9f7   : > { %p20_p1 = scmp.ge.s32.totalorder %s23_s30, 6   ;;  %s2010_s27 = sld [smem:[#allocation13_spill]] }
 0x9f8   : > { %s2011_s17 = sld [smem:[#allocation14_spill]]  ;;  %s2013_s21 = smov %s1540_s22 }
 0x9f9   : > { %s2012_s29 = sld [smem:[#allocation15_spill]]  ;;  %s2014_s22 = smov %s1544_s23 }
 0x9fa   : > { %s2015_s23 = smov %s1704_s19  ;;  %s2016_s24 = smov %s1552_s25 }
 0x9fb   : > { %s2018_s26 = smov %s1564_s28  ;;  %22 = sbr.rel (!%p20_p1) target bundleno = 12 (0xc), region = 204 }
 0x9fc   : > { %s2017_s25 = smov %s2009_s15 }
 0x9fe   : > { %s2019_s28 = smov %s2011_s17 }
 0xa00   :  { %1074 = vsyncpa [#allocation8], 1 }
 0xa01   :  { %1076 = vsyncpa [#allocation8 + $0x1], 1 }
 0xa02   :  { %1077 = vsyncpa [#allocation10], 1 }
 0xa03   :  { %1079 = vsyncpa [#allocation10 + $0x1], 1 }

</bundles_post_ra>
